<compile_context>
chip_gen: v6e
topology: v6e:2x2x1
jax: 0.10.0
libtpu: 0.0.40
codegen_flags: <defaults>
</compile_context>

<pallas_src>
import jax
import jax.numpy as jnp
from jax.experimental import pallas as pl
from jax.experimental.pallas import tpu as pltpu


def _anet_kernel(u_rep_ref, u_imp_ref, i_rep_ref, i_imp_ref,
                 u_out_ref, i_out_ref):
    # u_rep_ref / i_rep_ref: (K, tb, H)   aspect-major, dense 2-D slabs per k
    # u_imp_ref / i_imp_ref: (tb, K)
    # u_out_ref / i_out_ref: (tb, H)
    num_aspects = u_rep_ref.shape[0]

    u_imp = u_imp_ref[...]
    i_imp = i_imp_ref[...]

    # Multiply in the input dtype (bf16 stays bf16 on v6e/v7x VALUs),
    # accumulate the K-sum in f32, cast once at the end.
    u_acc = (u_imp[:, 0:1] * u_rep_ref[0]).astype(jnp.float32)
    i_acc = (i_imp[:, 0:1] * i_rep_ref[0]).astype(jnp.float32)
    for k in range(1, num_aspects):
        u_acc = u_acc + (u_imp[:, k:k + 1] * u_rep_ref[k]).astype(jnp.float32)
        i_acc = i_acc + (i_imp[:, k:k + 1] * i_rep_ref[k]).astype(jnp.float32)

    u_out_ref[...] = u_acc.astype(u_out_ref.dtype)
    i_out_ref[...] = i_acc.astype(i_out_ref.dtype)


def _round_up(x, m):
    return ((x + m - 1) // m) * m


def _pick_batch_tile(batch, num_aspects, hidden, itemsize, vmem_budget_bytes):
    """Largest batch tile whose double-buffered pipeline fits the VMEM budget.

    Per grid step (double-buffered => x2; user+item streams => x2):
      rep block (K, tb, H), imp block (tb, K), out block (tb, H),
    with the lane dim conservatively padded to 128 for VMEM accounting.
    """
    lanes_h = _round_up(hidden, 128)
    lanes_k = _round_up(num_aspects, 128)
    per_row = 2 * 2 * itemsize * (num_aspects * lanes_h + lanes_k + lanes_h)
    tb = vmem_budget_bytes // per_row
    tb = min(tb, 1024)            # beyond ~512-1024 rows the pipeline saturates
    tb = max(8, (tb // 8) * 8)    # keep sublanes dense
    if tb >= batch:
        return batch
    return tb


def anet_forward(user_asp_rep, item_asp_rep, user_asp_impt, item_asp_impt,
                 *, batch_tile=None, vmem_budget_bytes=24 * 1024 * 1024):
    """Pallas implementation of ANet.forward.

    Args:
      user_asp_rep: (B, K, H)
      item_asp_rep: (B, K, H)
      user_asp_impt: (B, K)
      item_asp_impt: (B, K)
    Returns:
      (userANetLF, itemANetLF) each of shape (B, H)
    """
    B, K, H = user_asp_rep.shape
    assert item_asp_rep.shape == (B, K, H)
    assert user_asp_impt.shape == (B, K)
    assert item_asp_impt.shape == (B, K)

    out_dtype = user_asp_rep.dtype
    itemsize = jnp.dtype(out_dtype).itemsize

    # Layout plumbing: aspect-major reps -> each per-aspect slab inside the
    # kernel is a well-tiled 2-D (tb, H) array.
    u_rep = jnp.transpose(user_asp_rep, (1, 0, 2))   # (K, B, H)
    i_rep = jnp.transpose(item_asp_rep, (1, 0, 2))   # (K, B, H)

    if batch_tile is None:
        tb = _pick_batch_tile(B, K, H, itemsize, vmem_budget_bytes)
    else:
        tb = int(batch_tile)
        if tb >= B:
            tb = B
        else:
            tb = max(8, (tb // 8) * 8)   # sublane rule

    grid_b = pl.cdiv(B, tb)
    Bp = grid_b * tb

    u_imp, i_imp = user_asp_impt, item_asp_impt
    if Bp != B:
        pad = Bp - B
        u_rep = jnp.pad(u_rep, ((0, 0), (0, pad), (0, 0)))
        i_rep = jnp.pad(i_rep, ((0, 0), (0, pad), (0, 0)))
        u_imp = jnp.pad(u_imp, ((0, pad), (0, 0)))
        i_imp = jnp.pad(i_imp, ((0, pad), (0, 0)))

    rep_spec = pl.BlockSpec((K, tb, H), lambda b: (0, b, 0))
    imp_spec = pl.BlockSpec((tb, K), lambda b: (b, 0))
    out_spec = pl.BlockSpec((tb, H), lambda b: (b, 0))

    # Advisory cost estimate: mem-bound (~0.5 FLOP/byte).
    flops = 4 * B * K * H  # 2 streams x (mul + add) per element
    bytes_accessed = itemsize * (2 * B * K * H + 2 * B * K + 2 * B * H)
    cost = pl.CostEstimate(flops=flops, transcendentals=0,
                           bytes_accessed=bytes_accessed)

    u_out, i_out = pl.pallas_call(
        _anet_kernel,
        out_shape=(jax.ShapeDtypeStruct((Bp, H), out_dtype),
                   jax.ShapeDtypeStruct((Bp, H), out_dtype)),
        grid_spec=pltpu.PrefetchScalarGridSpec(
            num_scalar_prefetch=0,
            grid=(grid_b,),
            in_specs=[rep_spec, imp_spec, rep_spec, imp_spec],
            out_specs=[out_spec, out_spec],
        ),
        compiler_params=pltpu.CompilerParams(
            dimension_semantics=("parallel",),
            vmem_limit_bytes=48 * 1024 * 1024,   # headroom even on v7x (64 MiB)
        ),
        cost_estimate=cost,
    )(u_rep, u_imp, i_rep, i_imp)

    if Bp != B:
        u_out = u_out[:B]
        i_out = i_out[:B]
    return u_out, i_out


def _anet_reference(user_asp_rep, item_asp_rep, user_asp_impt, item_asp_impt):
    u = jnp.einsum("bk,bkh->bh", user_asp_impt, user_asp_rep)
    i = jnp.einsum("bk,bkh->bh", item_asp_impt, item_asp_rep)
    return u, i


if __name__ == "__main__":
    # Small, module-consistent shapes: batch=8, num_aspects=4, hidden=32.
    B, K, H = 8, 4, 32
    key = jax.random.PRNGKey(0)
    k1, k2, k3, k4 = jax.random.split(key, 4)

    user_asp_rep = jax.random.normal(k1, (B, K, H), dtype=jnp.float32)
    item_asp_rep = jax.random.normal(k2, (B, K, H), dtype=jnp.float32)
    user_asp_impt = jax.nn.softmax(jax.random.normal(k3, (B, K)), axis=-1)
    item_asp_impt = jax.nn.softmax(jax.random.normal(k4, (B, K)), axis=-1)

    u_out, i_out = anet_forward(user_asp_rep, item_asp_rep,
                                user_asp_impt, item_asp_impt)
    jax.block_until_ready((u_out, i_out))

    u_ref, i_ref = _anet_reference(user_asp_rep, item_asp_rep,
                                   user_asp_impt, item_asp_impt)
    assert u_out.shape == (B, H) and i_out.shape == (B, H)
    assert jnp.allclose(u_out, u_ref, atol=1e-5, rtol=1e-5)
    assert jnp.allclose(i_out, i_ref, atol=1e-5, rtol=1e-5)

    print("KERNEL_OK")
</pallas_src>

<mosaic_0001>
module attributes {stable_mosaic.version = 11 : i64} {
  func.func @_anet_kernel(%arg0: i32, %arg1: memref<4x8x32xf32, #tpu.memory_space<vmem>>, %arg2: memref<8x4xf32, #tpu.memory_space<vmem>>, %arg3: memref<4x8x32xf32, #tpu.memory_space<vmem>>, %arg4: memref<8x4xf32, #tpu.memory_space<vmem>>, %arg5: memref<8x32xf32, #tpu.memory_space<vmem>>, %arg6: memref<8x32xf32, #tpu.memory_space<vmem>>) attributes {dimension_semantics = [#tpu.dimension_semantics<parallel>], iteration_bounds = array<i64: 1>, scalar_prefetch = 0 : i64, scratch_operands = 0 : i64, tpu.core_type = #tpu.core_type<tc>, window_params = [{transform_indices = @transform_0, window_bounds = array<i64: 4, 8, 32>}, {transform_indices = @transform_1, window_bounds = array<i64: 8, 4>}, {transform_indices = @transform_2, window_bounds = array<i64: 4, 8, 32>}, {transform_indices = @transform_3, window_bounds = array<i64: 8, 4>}, {transform_indices = @transform_4, window_bounds = array<i64: 8, 32>}, {transform_indices = @transform_5, window_bounds = array<i64: 8, 32>}]} {
    %c0 = arith.constant 0 : index
    %c0_0 = arith.constant 0 : index
    %0 = vector.load %arg2[%c0, %c0_0] : memref<8x4xf32, #tpu.memory_space<vmem>>, vector<8x4xf32>
    %c0_1 = arith.constant 0 : index
    %c0_2 = arith.constant 0 : index
    %1 = vector.load %arg4[%c0_1, %c0_2] : memref<8x4xf32, #tpu.memory_space<vmem>>, vector<8x4xf32>
    %2 = vector.extract_strided_slice %0 {offsets = [0, 0], sizes = [8, 1], strides = [1, 1]} : vector<8x4xf32> to vector<8x1xf32>
    %c0_3 = arith.constant 0 : index
    %c0_4 = arith.constant 0 : index
    %c0_5 = arith.constant 0 : index
    %3 = vector.load %arg1[%c0_3, %c0_4, %c0_5] : memref<4x8x32xf32, #tpu.memory_space<vmem>>, vector<1x8x32xf32>
    %4 = vector.shape_cast %3 : vector<1x8x32xf32> to vector<8x32xf32>
    %5 = vector.broadcast %2 : vector<8x1xf32> to vector<8x32xf32>
    %6 = arith.mulf %5, %4 : vector<8x32xf32>
    %7 = vector.extract_strided_slice %1 {offsets = [0, 0], sizes = [8, 1], strides = [1, 1]} : vector<8x4xf32> to vector<8x1xf32>
    %c0_6 = arith.constant 0 : index
    %c0_7 = arith.constant 0 : index
    %c0_8 = arith.constant 0 : index
    %8 = vector.load %arg3[%c0_6, %c0_7, %c0_8] : memref<4x8x32xf32, #tpu.memory_space<vmem>>, vector<1x8x32xf32>
    %9 = vector.shape_cast %8 : vector<1x8x32xf32> to vector<8x32xf32>
    %10 = vector.broadcast %7 : vector<8x1xf32> to vector<8x32xf32>
    %11 = arith.mulf %10, %9 : vector<8x32xf32>
    %12 = vector.extract_strided_slice %0 {offsets = [0, 1], sizes = [8, 1], strides = [1, 1]} : vector<8x4xf32> to vector<8x1xf32>
    %c1 = arith.constant 1 : index
    %c0_9 = arith.constant 0 : index
    %c0_10 = arith.constant 0 : index
    %13 = vector.load %arg1[%c1, %c0_9, %c0_10] : memref<4x8x32xf32, #tpu.memory_space<vmem>>, vector<1x8x32xf32>
    %14 = vector.shape_cast %13 : vector<1x8x32xf32> to vector<8x32xf32>
    %15 = vector.broadcast %12 : vector<8x1xf32> to vector<8x32xf32>
    %16 = arith.mulf %15, %14 : vector<8x32xf32>
    %17 = arith.addf %6, %16 : vector<8x32xf32>
    %18 = vector.extract_strided_slice %1 {offsets = [0, 1], sizes = [8, 1], strides = [1, 1]} : vector<8x4xf32> to vector<8x1xf32>
    %c1_11 = arith.constant 1 : index
    %c0_12 = arith.constant 0 : index
    %c0_13 = arith.constant 0 : index
    %19 = vector.load %arg3[%c1_11, %c0_12, %c0_13] : memref<4x8x32xf32, #tpu.memory_space<vmem>>, vector<1x8x32xf32>
    %20 = vector.shape_cast %19 : vector<1x8x32xf32> to vector<8x32xf32>
    %21 = vector.broadcast %18 : vector<8x1xf32> to vector<8x32xf32>
    %22 = arith.mulf %21, %20 : vector<8x32xf32>
    %23 = arith.addf %11, %22 : vector<8x32xf32>
    %24 = vector.extract_strided_slice %0 {offsets = [0, 2], sizes = [8, 1], strides = [1, 1]} : vector<8x4xf32> to vector<8x1xf32>
    %c2 = arith.constant 2 : index
    %c0_14 = arith.constant 0 : index
    %c0_15 = arith.constant 0 : index
    %25 = vector.load %arg1[%c2, %c0_14, %c0_15] : memref<4x8x32xf32, #tpu.memory_space<vmem>>, vector<1x8x32xf32>
    %26 = vector.shape_cast %25 : vector<1x8x32xf32> to vector<8x32xf32>
    %27 = vector.broadcast %24 : vector<8x1xf32> to vector<8x32xf32>
    %28 = arith.mulf %27, %26 : vector<8x32xf32>
    %29 = arith.addf %17, %28 : vector<8x32xf32>
    %30 = vector.extract_strided_slice %1 {offsets = [0, 2], sizes = [8, 1], strides = [1, 1]} : vector<8x4xf32> to vector<8x1xf32>
    %c2_16 = arith.constant 2 : index
    %c0_17 = arith.constant 0 : index
    %c0_18 = arith.constant 0 : index
    %31 = vector.load %arg3[%c2_16, %c0_17, %c0_18] : memref<4x8x32xf32, #tpu.memory_space<vmem>>, vector<1x8x32xf32>
    %32 = vector.shape_cast %31 : vector<1x8x32xf32> to vector<8x32xf32>
    %33 = vector.broadcast %30 : vector<8x1xf32> to vector<8x32xf32>
    %34 = arith.mulf %33, %32 : vector<8x32xf32>
    %35 = arith.addf %23, %34 : vector<8x32xf32>
    %36 = vector.extract_strided_slice %0 {offsets = [0, 3], sizes = [8, 1], strides = [1, 1]} : vector<8x4xf32> to vector<8x1xf32>
    %c3 = arith.constant 3 : index
    %c0_19 = arith.constant 0 : index
    %c0_20 = arith.constant 0 : index
    %37 = vector.load %arg1[%c3, %c0_19, %c0_20] : memref<4x8x32xf32, #tpu.memory_space<vmem>>, vector<1x8x32xf32>
    %38 = vector.shape_cast %37 : vector<1x8x32xf32> to vector<8x32xf32>
    %39 = vector.broadcast %36 : vector<8x1xf32> to vector<8x32xf32>
    %40 = arith.mulf %39, %38 : vector<8x32xf32>
    %41 = arith.addf %29, %40 : vector<8x32xf32>
    %42 = vector.extract_strided_slice %1 {offsets = [0, 3], sizes = [8, 1], strides = [1, 1]} : vector<8x4xf32> to vector<8x1xf32>
    %c3_21 = arith.constant 3 : index
    %c0_22 = arith.constant 0 : index
    %c0_23 = arith.constant 0 : index
    %43 = vector.load %arg3[%c3_21, %c0_22, %c0_23] : memref<4x8x32xf32, #tpu.memory_space<vmem>>, vector<1x8x32xf32>
    %44 = vector.shape_cast %43 : vector<1x8x32xf32> to vector<8x32xf32>
    %45 = vector.broadcast %42 : vector<8x1xf32> to vector<8x32xf32>
    %46 = arith.mulf %45, %44 : vector<8x32xf32>
    %47 = arith.addf %35, %46 : vector<8x32xf32>
    %c0_24 = arith.constant 0 : index
    %c0_25 = arith.constant 0 : index
    %48 = vector.load %arg5[%c0_24, %c0_25] : memref<8x32xf32, #tpu.memory_space<vmem>>, vector<8x32xf32>
    tpu.vector_store %arg5[%c0_24, %c0_25], %41 {strides = array<i32>} : memref<8x32xf32, #tpu.memory_space<vmem>>, vector<8x32xf32>,
    %c0_26 = arith.constant 0 : index
    %c0_27 = arith.constant 0 : index
    %49 = vector.load %arg6[%c0_26, %c0_27] : memref<8x32xf32, #tpu.memory_space<vmem>>, vector<8x32xf32>
    tpu.vector_store %arg6[%c0_26, %c0_27], %47 {strides = array<i32>} : memref<8x32xf32, #tpu.memory_space<vmem>>, vector<8x32xf32>,
    return
  }
  func.func @transform_0(%arg0: i32) -> (i32, i32, i32) {
    %c0_i32 = arith.constant 0 : i32
    %c0_i32_0 = arith.constant 0 : i32
    %c0_i32_1 = arith.constant 0 : i32
    return %c0_i32, %arg0, %c0_i32_0 : i32, i32, i32
  }
  func.func @transform_1(%arg0: i32) -> (i32, i32) {
    %c0_i32 = arith.constant 0 : i32
    %c0_i32_0 = arith.constant 0 : i32
    return %arg0, %c0_i32 : i32, i32
  }
  func.func @transform_2(%arg0: i32) -> (i32, i32, i32) {
    %c0_i32 = arith.constant 0 : i32
    %c0_i32_0 = arith.constant 0 : i32
    %c0_i32_1 = arith.constant 0 : i32
    return %c0_i32, %arg0, %c0_i32_0 : i32, i32, i32
  }
  func.func @transform_3(%arg0: i32) -> (i32, i32) {
    %c0_i32 = arith.constant 0 : i32
    %c0_i32_0 = arith.constant 0 : i32
    return %arg0, %c0_i32 : i32, i32
  }
  func.func @transform_4(%arg0: i32) -> (i32, i32) {
    %c0_i32 = arith.constant 0 : i32
    %c0_i32_0 = arith.constant 0 : i32
    return %arg0, %c0_i32 : i32, i32
  }
  func.func @transform_5(%arg0: i32) -> (i32, i32) {
    %c0_i32 = arith.constant 0 : i32
    %c0_i32_0 = arith.constant 0 : i32
    return %arg0, %c0_i32 : i32, i32
  }
}

</mosaic_0001>

<bundles_post_ra>
// kernel: tpu_custom_call.1
= control target key start
LH: loop header
LB: loop body
LE: loop exit
PB: predicated region body
PF: predicated region fallthrough
CT: control target
= control target key end

     0   :  { %11 = vsyncpa [#allocation3], 0  ;;  %s308_s0 = inlined_call_operand.hbm [shape: f32[4,8,32], index: 0, kind: input, shape index: {}]   ;;  %s309_s1 = inlined_call_operand.vmem [shape: f32[8,4], index: 1, kind: input, shape index: {}]   ;;  %s310_s2 = inlined_call_operand.hbm [shape: f32[4,8,32], index: 2, kind: input, shape index: {}]   ;;  %s311_s3 = inlined_call_operand.vmem [shape: f32[8,4], index: 3, kind: input, shape index: {}]   ;;  %s312_s4 = inlined_call_operand.hbm [shape: f32[8,32], index: 4, kind: output, shape index: {0}]   ;;  %s313_s5 = inlined_call_operand.hbm [shape: f32[8,32], index: 5, kind: output, shape index: {1}]  }
   0x1   :  { %12 = vsyncpa [#allocation6], 0 }
   0x2   :  { %13 = vsyncpa [#allocation4], 0 }
   0x3   :  { %14 = vsyncpa [#allocation9], 0  ;;  %s250_s18 = smov [#allocation2]  }
   0x4   :  { %s20_s19 = sshll.u32 %s250_s18, 4  ;;  %s21_s19 = int_to_ptr.vmem [resolvable:$true] %s20_s19 }
   0x5   :  { %s170_s20 = scalar_lea.vmem %s21_s19, 512  ;;  %p175_p1 = scmp.lt.s32.totalorder %s21_s19, %s21_s19 }
   0x6   :  { %p171_p0 = scmp.ne.s32.totalorder %s21_s19, %s170_s20  ;;  %p176_p2 = scmp.lt.s32.totalorder %s170_s20, %s170_s20 }
   0x8   :  { %p177_p3 = por %p176_p2, %p175_p1 }
   0xa   :  { %p178_p4 = pnand %p177_p3, %p171_p0 }
   0xc   :  { %181 = shalt.err (!%p178_p4)
}
   0xd   :  { %s251_s21 = smov 128   ;;  %s252_s22 = smov 8  }
   0xe   :  { %26 = dma.hbm_to_vmem [thread:$0]  %s308_s0, 512, %s21_s19, [#allocation3], %s251_s21, %s251_s21, %s252_s22  }
   0xf   :  { %s253_s25 = smov [#allocation5]  }
  0x10   :  { %s34_s26 = sshll.u32 %s253_s25, 4  ;;  %s35_s26 = int_to_ptr.vmem [resolvable:$true] %s34_s26 }
  0x11   :  { %s190_s27 = scalar_lea.vmem %s35_s26, 512  ;;  %p195_p6 = scmp.lt.s32.totalorder %s35_s26, %s35_s26 }
  0x12   :  { %p191_p5 = scmp.ne.s32.totalorder %s35_s26, %s190_s27  ;;  %p196_p7 = scmp.lt.s32.totalorder %s190_s27, %s190_s27 }
  0x14   :  { %p197_p8 = por %p196_p7, %p195_p6 }
  0x16   :  { %p198_p9 = pnand %p197_p8, %p191_p5 }
  0x18   :  { %201 = shalt.err (!%p198_p9)
}
  0x19   :  { %40 = dma.hbm_to_vmem [thread:$0]  %s310_s2, 512, %s35_s26, [#allocation6], %s251_s21, %s251_s21, %s252_s22  }
  0x1a   :  { %242 = dma.done.wait [#allocation3], 512  }
  0x1b   :  { %243 = vsyncadd [#allocation3], 4294966784 }
  0x1c   :  { %244 = dma.done.wait [#allocation6], 512  }
  0x1d   :  { %245 = vsyncadd [#allocation6], 4294966784  ;;  %v254_v0 = vmov 1   ;;  %v255_v1 = vmov 0   ;;  %v49_v2 = vld [vmem:[%s309_s1] sm:$0xff]  ;;  %v256_v4 = vmov 2  }
  0x1e   :  { %157 = vset.pattern.permute.xlu1 %v254_v0  ;;  %156 = vset.pattern.permute.xlu0 %v255_v1  ;;  %v50_v3 = vld [vmem:[%s311_s3] sm:$0xff]  ;;  %v257_v5 = vmov 3   ;;  %v66_v10 = vld [vmem:[#allocation2 + $0x8] sm:$0xff]  ;;  %v90_v14 = vld [vmem:[#allocation5 + $0x10] sm:$0xff]  ;;  %s258_s1 = smov [#allocation7]   ;;  %s259_s3 = smov [#allocation8]  }
  0x1f   :  { %68 = vperm.xlu1 %157, %v49_v2   ;;  %54 = vperm.xlu0 %156, %v49_v2   ;;  %v51_v11 = vld [vmem:[#allocation2] sm:$0xff]  ;;  %v74_v12 = vld [vmem:[#allocation5 + $0x8] sm:$0xff]  ;;  %v82_v15 = vld [vmem:[#allocation2 + $0x10] sm:$0xff]  ;;  %s122_s2 = sshll.u32 %s258_s1, 4  ;;  %s132_s8 = sshll.u32 %s259_s3, 4  ;;  %vm113_vm0 = vcmask 261120   ;;  %s123_s2 = int_to_ptr.vmem [resolvable:$true] %s122_s2  ;;  %s133_s8 = int_to_ptr.vmem [resolvable:$true] %s132_s8 }
  0x20   :  { %v58_v13 = vld [vmem:[#allocation5] sm:$0xff]  ;;  %v98_v24 = vld [vmem:[#allocation2 + $0x18] sm:$0xff]  ;;  %s202_s9 = scalar_lea.vmem %s123_s2, 128  ;;  %p207_p11 = scmp.lt.s32.totalorder %s123_s2, %s123_s2 }
  0x21   :  { %v106_v25 = vld [vmem:[#allocation5 + $0x18] sm:$0xff]  ;;  %p203_p10 = scmp.ne.s32.totalorder %s123_s2, %s202_s9  ;;  %p208_p12 = scmp.lt.s32.totalorder %s202_s9, %s202_s9 }
  0x23   :  { %76 = vperm.xlu1 %157, %v50_v3   ;;  %61 = vperm.xlu0 %156, %v50_v3   ;;  %p209_p13 = por %p208_p12, %p207_p11 }
  0x25   :  { %p210_p0 = pnand %p209_p13, %p203_p10 }
  0x27   :  { %159 = vset.pattern.permute.xlu1 %v256_v4  ;;  %158 = vset.pattern.permute.xlu0 %v256_v4 }
  0x28   :  { %92 = vperm.xlu1 %159, %v50_v3   ;;  %84 = vperm.xlu0 %158, %v49_v2  }
  0x2c   :  { %160 = vset.pattern.permute.xlu1 %v257_v5  ;;  %161 = vset.pattern.permute.xlu0 %v257_v5 }
  0x2d   :  { %100 = vperm.xlu1 %160, %v49_v2   ;;  %108 = vperm.xlu0 %161, %v50_v3  }
  0x9a   :  { %v69_v6 = vpop.permute.xlu1 %68  ;;  %v55_v7 = vpop.permute.xlu0 %54 }
  0x9b   :  { %v71_v16 = vmul.f32 %v69_v6, %v66_v10  ;;  %v57_v17 = vmul.f32 %v55_v7, %v51_v11 }
  0x9d   :  { %v72_v26 = vadd.f32 %v71_v16, %v57_v17 }
  0x9e   :  { %v77_v8 = vpop.permute.xlu1 %76  ;;  %v62_v9 = vpop.permute.xlu0 %61 }
  0x9f   :  { %v79_v18 = vmul.f32 %v77_v8, %v74_v12  ;;  %v64_v19 = vmul.f32 %v62_v9, %v58_v13 }
  0xa1   :  { %v80_v27 = vadd.f32 %v79_v18, %v64_v19 }
  0xa3   :  { %v93_v20 = vpop.permute.xlu1 %92  ;;  %v85_v21 = vpop.permute.xlu0 %84 }
  0xa4   :  { %v95_v22 = vmul.f32 %v93_v20, %v90_v14  ;;  %v87_v23 = vmul.f32 %v85_v21, %v82_v15 }
  0xa6   :  { %v96_v30 = vadd.f32 %v95_v22, %v80_v27  ;;  %v88_v31 = vadd.f32 %v87_v23, %v72_v26 }
  0xa8   :  { %v101_v28 = vpop.permute.xlu1 %100  ;;  %v109_v29 = vpop.permute.xlu0 %108 }
  0xa9   :  { %v103_v32 = vmul.f32 %v101_v28, %v98_v24  ;;  %v111_v33 = vmul.f32 %v109_v29, %v106_v25 }
  0xab   :  { %v104_v34 = vadd.f32 %v103_v32, %v88_v31  ;;  %v112_v35 = vadd.f32 %v111_v33, %v96_v30 }
  0xad   :  { %114 = vst.msk [vmem:[#allocation7] sm:$0xff] %vm113_vm0, %v104_v34  ;;  %115 = vst.msk [vmem:[#allocation8] sm:$0xff] %vm113_vm0, %v112_v35 }
  0xae   :  { %213 = shalt.err (!%p210_p0)
}
  0xaf   :  { %125 = dma.vmem_to_hbm [thread:$0]  %s123_s2, 128, %s312_s4, [#allocation4]  }
  0xb0   :  { %s222_s12 = scalar_lea.vmem %s133_s8, 128  ;;  %p227_p2 = scmp.lt.s32.totalorder %s133_s8, %s133_s8 }
  0xb1   :  { %p223_p1 = scmp.ne.s32.totalorder %s133_s8, %s222_s12  ;;  %p228_p3 = scmp.lt.s32.totalorder %s222_s12, %s222_s12 }
  0xb3   :  { %p229_p4 = por %p228_p3, %p227_p2 }
  0xb5   :  { %p230_p5 = pnand %p229_p4, %p223_p1 }
  0xb7   :  { %233 = shalt.err (!%p230_p5)
}
  0xb8   :  { %135 = dma.vmem_to_hbm [thread:$0]  %s133_s8, 128, %s313_s5, [#allocation9]  }
  0xb9   :  { %246 = dma.done.wait [#allocation4], 128  }
  0xba   :  { %247 = vsyncadd [#allocation4], 4294967168 }
  0xbb   :  { %248 = dma.done.wait [#allocation9], 128  }
  0xbc   :  { %249 = vsyncadd [#allocation9], 4294967168 }
  0xbd   :  { %142 = vsyncpa [#allocation3], 1 }
  0xbe   :  { %143 = vsyncpa [#allocation6], 1 }
  0xbf   :  { %144 = vsyncpa [#allocation4], 1 }
  0xc0   :  { %145 = vsyncpa [#allocation9], 1 }

</bundles_post_ra>
